<compile_context>
chip_gen: v7x
topology: tpu7x:2x2x1
jax: 0.10.0
libtpu: 0.0.40
codegen_flags: <defaults>
</compile_context>

<pallas_src>
import functools

import jax
import jax.numpy as jnp
import numpy as np
from jax import lax
from jax.experimental import pallas as pl
from jax.experimental.pallas import tpu as pltpu


def _conv_relu_bn_kernel(p_ref, w_ref, scale_ref, shift_ref, o_ref):
    """One (Cout, tile_m) output tile, M on lanes.

    p_ref:     (Kp, TM)    im2col patches (+ ones row for bias), compute dtype
    w_ref:     (Cout, Kp)  reshaped conv weight (+ bias column), compute dtype
    scale_ref: (Cout, 1)   BN scale = gamma / sqrt(var + eps)   (f32)
    shift_ref: (Cout, 1)   BN shift = beta - mean * scale       (f32)
    o_ref:     (Cout, TM)  output tile (f32), lane-dense
    """
    acc = jnp.dot(w_ref[...], p_ref[...], preferred_element_type=jnp.float32)
    acc = jnp.maximum(acc, 0.0)                                    # ReLU (bias already in matmul)
    o_ref[...] = (acc * scale_ref[...] + shift_ref[...]).astype(o_ref.dtype)


@functools.partial(
    jax.jit, static_argnames=("stride", "eps", "tile_m", "compute_dtype"))
def dqn_conv_block(x_nchw, w_oihw, bias, gamma, beta, run_mean, run_var,
                   *, stride=1, eps=1e-5, tile_m=256,
                   compute_dtype=jnp.bfloat16):
    N, Cin, H, W = x_nchw.shape
    Cout, _, KH, KW = w_oihw.shape
    Ho = (H - KH) // stride + 1
    Wo = (W - KW) // stride + 1
    K = KH * KW * Cin
    M = N * Ho * Wo

    # ---- glue: im2col directly in (K, M) layout (fused into input DMA) -----
    # K index order = (kh, kw, ci); M index order = (n, oh, ow).
    taps = []
    for kh in range(KH):
        for kw in range(KW):
            t = lax.slice(
                x_nchw, (0, 0, kh, kw),
                (N, Cin, kh + (Ho - 1) * stride + 1, kw + (Wo - 1) * stride + 1),
                (1, 1, stride, stride))                       # (N, Cin, Ho, Wo)
            taps.append(jnp.transpose(t, (1, 0, 2, 3)).reshape(Cin, M))
    patches = jnp.concatenate(taps, axis=0)                   # (K, M)
    # Fold conv bias into the matmul: ones row in patches, bias column in W.
    patches = jnp.concatenate([patches, jnp.ones((1, M), patches.dtype)], axis=0)
    w_mat = jnp.transpose(w_oihw, (0, 2, 3, 1)).reshape(Cout, K)   # (Cout, K)
    w_mat = jnp.concatenate([w_mat, bias.reshape(Cout, 1)], axis=1)

    # Pad K to a sublane multiple and M to a whole number of lane tiles.
    K_aug = K + 1
    Kp = ((K_aug + 7) // 8) * 8
    Mp = pl.cdiv(M, tile_m) * tile_m
    patches = jnp.pad(patches, ((0, Kp - K_aug), (0, Mp - M)))
    w_mat = jnp.pad(w_mat, ((0, 0), (0, Kp - K_aug)))
    patches = patches.astype(compute_dtype)   # pass compute_dtype=jnp.float32 for exact f32 semantics
    w_mat = w_mat.astype(compute_dtype)

    # Eval-mode BatchNorm folded into a per-channel affine (kept in f32).
    scale = (gamma / jnp.sqrt(run_var + eps)).astype(jnp.float32)
    shift = (beta - run_mean * scale).astype(jnp.float32)

    # ---- hot path: single fused matmul + ReLU + BN affine -------------------
    grid = (Mp // tile_m,)
    out_cm = pl.pallas_call(
        _conv_relu_bn_kernel,
        out_shape=jax.ShapeDtypeStruct((Cout, Mp), x_nchw.dtype),
        grid=grid,
        in_specs=[
            pl.BlockSpec((Kp, tile_m), lambda i: (0, i)),     # patches: M-tile on lanes
            pl.BlockSpec((Cout, Kp), lambda i: (0, 0)),       # weight (+bias col)
            pl.BlockSpec((Cout, 1), lambda i: (0, 0)),        # BN scale
            pl.BlockSpec((Cout, 1), lambda i: (0, 0)),        # BN shift
        ],
        out_specs=pl.BlockSpec((Cout, tile_m), lambda i: (0, i)),
        compiler_params=pltpu.CompilerParams(
            dimension_semantics=("parallel",),
            # Let XLA fuse the im2col/transpose/pad glue into the input DMA
            # instead of materializing the 9x-inflated patches in HBM.
            allow_input_fusion=[True, True, False, False],
        ),
    )(patches, w_mat, scale.reshape(Cout, 1), shift.reshape(Cout, 1))

    # (Cout, Mp) -> (Cout, N, Ho, Wo) -> NCHW
    out = out_cm[:, :M].reshape(Cout, N, Ho, Wo).transpose(1, 0, 2, 3)
    return out


def _reference(x_nchw, w_oihw, bias, gamma, beta, run_mean, run_var,
               *, stride=1, eps=1e-5):
    """Plain-JAX f32 reference mirroring the PyTorch module in eval mode."""
    y = lax.conv_general_dilated(
        x_nchw, w_oihw, window_strides=(stride, stride), padding="VALID",
        dimension_numbers=("NCHW", "OIHW", "NCHW"))
    y = y + bias.reshape(1, -1, 1, 1)
    y = jnp.maximum(y, 0.0)
    scale = (gamma / jnp.sqrt(run_var + eps)).reshape(1, -1, 1, 1)
    shift = (beta - run_mean * gamma / jnp.sqrt(run_var + eps)).reshape(1, -1, 1, 1)
    return y * scale + shift   # dropout: identity in eval mode


if __name__ == "__main__":
    # Small shapes consistent with the module: DQNConvBlock(4, 8, 3, stride=1)
    N, Cin, H, W = 2, 4, 16, 16
    Cout, KH, KW, STRIDE = 8, 3, 3, 1

    key = jax.random.PRNGKey(0)
    kx, kw, kb, kg, kbe, km, kv = jax.random.split(key, 7)

    x = jax.random.normal(kx, (N, Cin, H, W), dtype=jnp.float32)

    fan_in = Cin * KH * KW
    bound = 1.0 / np.sqrt(fan_in)
    w = jax.random.uniform(kw, (Cout, Cin, KH, KW), jnp.float32, -bound, bound)
    b = jax.random.uniform(kb, (Cout,), jnp.float32, -bound, bound)
    gamma = 1.0 + 0.1 * jax.random.normal(kg, (Cout,), jnp.float32)
    beta = 0.1 * jax.random.normal(kbe, (Cout,), jnp.float32)
    run_mean = 0.1 * jax.random.normal(km, (Cout,), jnp.float32)
    run_var = 0.5 + jnp.abs(jax.random.normal(kv, (Cout,), jnp.float32))

    out = dqn_conv_block(x, w, b, gamma, beta, run_mean, run_var, stride=STRIDE)
    out = jax.block_until_ready(out)

    ref = _reference(x, w, b, gamma, beta, run_mean, run_var, stride=STRIDE)
    # bf16 matmul operands (f32 accumulation) -> loosened tolerance vs f32 ref.
    np.testing.assert_allclose(np.asarray(out), np.asarray(ref), rtol=2e-2, atol=2e-2)
    assert out.shape == (N, Cout, H - KH + 1, W - KW + 1)

    print("KERNEL_OK")
</pallas_src>

<mosaic_0001>
module attributes {stable_mosaic.version = 11 : i64} {
  func.func @_conv_relu_bn_kernel(%arg0: i32, %arg1: memref<40x256xbf16, #tpu.memory_space<vmem>>, %arg2: memref<8x40xbf16, #tpu.memory_space<vmem>>, %arg3: memref<8x1xf32, #tpu.memory_space<vmem>>, %arg4: memref<8x1xf32, #tpu.memory_space<vmem>>, %arg5: memref<8x256xf32, #tpu.memory_space<vmem>>) attributes {dimension_semantics = [#tpu.dimension_semantics<parallel>], iteration_bounds = array<i64: 2>, scalar_prefetch = 0 : i64, scratch_operands = 0 : i64, tpu.core_type = #tpu.core_type<tc>, window_params = [{transform_indices = @transform_0, window_bounds = array<i64: 40, 256>}, {pipeline_mode = #tpu.pipeline_mode<synchronous>, transform_indices = @transform_1, window_bounds = array<i64: 8, 40>}, {pipeline_mode = #tpu.pipeline_mode<synchronous>, transform_indices = @transform_2, window_bounds = array<i64: 8, 1>}, {pipeline_mode = #tpu.pipeline_mode<synchronous>, transform_indices = @transform_3, window_bounds = array<i64: 8, 1>}, {transform_indices = @transform_4, window_bounds = array<i64: 8, 256>}]} {
    %c0 = arith.constant 0 : index
    %c0_0 = arith.constant 0 : index
    %0 = vector.load %arg2[%c0, %c0_0] : memref<8x40xbf16, #tpu.memory_space<vmem>>, vector<8x40xbf16>
    %c0_1 = arith.constant 0 : index
    %c0_2 = arith.constant 0 : index
    %1 = vector.load %arg1[%c0_1, %c0_2] : memref<40x256xbf16, #tpu.memory_space<vmem>>, vector<40x256xbf16>
    %cst = arith.constant dense<0.000000e+00> : vector<8x256xf32>
    %2 = tpu.matmul %0, %1, %cst {dimension_numbers = #tpu.dot_dimension_numbers<[1], [0], [0], [1], [0, 0, 1, 1], [], []>} : vector<8x40xbf16>, vector<40x256xbf16>, vector<8x256xf32> -> vector<8x256xf32>
    %cst_3 = arith.constant 0.000000e+00 : f32
    %3 = vector.broadcast %cst_3 : f32 to vector<8x256xf32>
    %4 = arith.maximumf %2, %3 : vector<8x256xf32>
    %c0_4 = arith.constant 0 : index
    %c0_5 = arith.constant 0 : index
    %5 = vector.load %arg3[%c0_4, %c0_5] : memref<8x1xf32, #tpu.memory_space<vmem>>, vector<8x1xf32>
    %6 = vector.broadcast %5 : vector<8x1xf32> to vector<8x256xf32>
    %7 = arith.mulf %4, %6 : vector<8x256xf32>
    %c0_6 = arith.constant 0 : index
    %c0_7 = arith.constant 0 : index
    %8 = vector.load %arg4[%c0_6, %c0_7] : memref<8x1xf32, #tpu.memory_space<vmem>>, vector<8x1xf32>
    %9 = vector.broadcast %8 : vector<8x1xf32> to vector<8x256xf32>
    %10 = arith.addf %7, %9 : vector<8x256xf32>
    %c0_8 = arith.constant 0 : index
    %c0_9 = arith.constant 0 : index
    %11 = vector.load %arg5[%c0_8, %c0_9] : memref<8x256xf32, #tpu.memory_space<vmem>>, vector<8x256xf32>
    tpu.vector_store %arg5[%c0_8, %c0_9], %10 {strides = array<i32>} : memref<8x256xf32, #tpu.memory_space<vmem>>, vector<8x256xf32>,
    return
  }
  func.func @transform_0(%arg0: i32) -> (i32, i32) {
    %c0_i32 = arith.constant 0 : i32
    %c0_i32_0 = arith.constant 0 : i32
    return %c0_i32, %arg0 : i32, i32
  }
  func.func @transform_1(%arg0: i32) -> (i32, i32) {
    %c0_i32 = arith.constant 0 : i32
    %c0_i32_0 = arith.constant 0 : i32
    %c0_i32_1 = arith.constant 0 : i32
    return %c0_i32, %c0_i32_0 : i32, i32
  }
  func.func @transform_2(%arg0: i32) -> (i32, i32) {
    %c0_i32 = arith.constant 0 : i32
    %c0_i32_0 = arith.constant 0 : i32
    %c0_i32_1 = arith.constant 0 : i32
    return %c0_i32, %c0_i32_0 : i32, i32
  }
  func.func @transform_3(%arg0: i32) -> (i32, i32) {
    %c0_i32 = arith.constant 0 : i32
    %c0_i32_0 = arith.constant 0 : i32
    %c0_i32_1 = arith.constant 0 : i32
    return %c0_i32, %c0_i32_0 : i32, i32
  }
  func.func @transform_4(%arg0: i32) -> (i32, i32) {
    %c0_i32 = arith.constant 0 : i32
    %c0_i32_0 = arith.constant 0 : i32
    return %c0_i32, %arg0 : i32, i32
  }
}

</mosaic_0001>

<bundles_post_ra>
// kernel: dqn_conv_block.2
= control target key start
LH: loop header
LB: loop body
LE: loop exit
PB: predicated region body
PF: predicated region fallthrough
CT: control target
= control target key end

     0   :  { %s1000_s11 = smov 0   ;;  %s1127_s0 = inlined_call_operand.vmem [shape: f32[8,1], index: 0, kind: input, shape index: {}]   ;;  %s1128_s1 = inlined_call_operand.vmem [shape: f32[8,1], index: 1, kind: input, shape index: {}]   ;;  %s1129_s2 = inlined_call_operand.vmem [shape: bf16[37,392], index: 2, kind: input, shape index: {}]   ;;  %s1130_s3 = inlined_call_operand.<no memory space> [shape: bf16[], index: 3, kind: input, shape index: {}]   ;;  %s1131_s4 = inlined_call_operand.vmem [shape: bf16[8,1], index: 4, kind: input, shape index: {}]   ;;  %s1132_s5 = inlined_call_operand.<no memory space> [shape: bf16[], index: 5, kind: input, shape index: {}]   ;;  %s1133_s6 = inlined_call_operand.<no memory space> [shape: s32[], index: 6, kind: input, shape index: {}]   ;;  %s1134_s7 = inlined_call_operand.vmem [shape: bf16[8,36], index: 7, kind: input, shape index: {}]   ;;  %s1135_s8 = inlined_call_operand.vmem [shape: f32[8,512], index: 8, kind: output, shape index: {}]  }
   0x1   :  { %v13_v0 = vstv %s1130_s3  ;;  %v18_v1 = vstv %s1132_s5  ;;  %v23_v2 = vstv %s1133_s6 }
   0x2   :  { %v996_v3 = vunpack.i.l.bf16 %v13_v0  ;;  %v998_v4 = vunpack.i.l.bf16 %v18_v1 }
   0x3 LB: > { %s850_s3 = sadd.s32 4294967295, %s937_s11   ;;  %p855_p0 = scmp.ge.s32.totalorder %s937_s11, 1  ;;  %s937_s11 = sphi %s1000_s11, %s39_s11  }
   0x4   : > { %p237_p1 = scmp.lt.s32.totalorder %s937_s11, 3 }
   0x6   : > { %p238_p2 = pnand %p855_p0, %p237_p1 }
   0x8   : > { %241 = sbr.rel (%p238_p2) target bundleno = 372 (0x174), region = 40 }
   0xf   : > { %v315_v5 = vlaneseq  ;;  %v620_v6 = vld [vmem:[%s1131_s4] sm:$0xf]  ;;  %s856_s13 = sshll.u32 %s850_s3, 1  ;;  %s1011_s14 = sshll.u32 %s850_s3, 8  ;;  %v939_v10 = vmov 0   ;;  %v941_v31 = vmov 0.0  }
  0x10   : > { %p281_p3 = scmp.lt.s32.totalorder %s856_s13, 3  ;;  %v317_v9 = vstv %s1011_s14  ;;  %s325_s15 = sadd.s32 1, %s856_s13  ;;  %750 = vmatprep.mubr.bf16.mxu0 %v939_v10  ;;  %921 = vset.pattern.permute.xlu0 %v939_v10  ;;  %v621_v11 = vunpack.c.l.bf16 %v620_v6  ;;  %v769_v25 = vld [vmem:[%s1128_s1] sm:$0xff]  ;;  %vm711_vm6 = vcmask 1043456   ;;  %vm707_vm9 = vcmask 326656  }
  0x11   : > { %v1013_v7 = vand.u32 127, %v315_v5  ;;  %v554_v8 = vshrl.u32 %v315_v5, 7  ;;  %922 = vset.pattern.permute.xlu1 %v939_v10  ;;  %s1022_s16 = ssub.s32 3, %s325_s15  ;;  %s940_s22 = smov 36   ;;  %v761_v28 = vld [vmem:[%s1127_s0] sm:$0xff] }
  0x12   : > { %s1139_s13 = smov (!%p281_p3, %s856_s13), 3  ;;  %p327_p4 = scmp.lt.s32.totalorder %s1022_s16, 0  ;;  %772 = vperm.xlu1 %922, %v769_v25   ;;  %v343_v40 = vstv %s1022_s16 }
  0x13   : > { %v1018_v12 = vadd.s32 32, %v554_v8  ;;  %v625_v13 = vadd.s32 128, %v1013_v7  ;;  %v318_v14 = vadd.s32 %v317_v9, %v1013_v7  ;;  %vm630_vm0 = vcmp.lt.s32.totalorder %v1013_v7, 92  ;;  %s857_s17 = sshll.u32 %s1139_s13, 2  ;;  %s892_s27 = sadd.s32 128, %s1011_s14 }
  0x14   : > { %s1030_s20 = scalar_lea.vmem %s1129_s2, %s857_s17  ;;  %v355_v38 = vstv %s892_s27  ;;  %vm1067_vm4 = vcmp.lt.s32.totalorder %v343_v40, 0  ;;  %vm649_vm7 = vcmp.lt.s32.totalorder %v1013_v7, 36  ;;  %vm657_vm8 = vcmp.lt.s32.totalorder %v1013_v7, %v23_v2  ;;  %s860_s19 = sshll.u32 %s1139_s13, 3 }
  0x15   : > { %vm626_vm1 = vcmp.lt.s32.totalorder %v625_v13, 129  ;;  %vm556_vm2 = vcmp.lt.s32.totalorder %v1018_v12, 37  ;;  %vm319_vm3 = vcmp.lt.s32.totalorder %v318_v14, 392  ;;  %s328_s21 = scalar_select %p327_p4, 0, 255  ;;  %v356_v41 = vadd.s32 %v355_v38, %v1013_v7 }
  0x16   : > { %v627_v15 = vsel %vm626_vm1, %v621_v11, %v998_v4  ;;  %v876_v16 = vld [vmem:[%s1030_s20 + $0x10] ss:$48 sps:$4 sm:$0xff]  }
  0x17   : > { %v631_v17 = vsel %vm630_vm0, %v627_v15, %v998_v4  ;;  %v551_v18 = vunpack.c.h.bf16 %v876_v16  ;;  %v306_v19 = vld [vmem:[%s1030_s20] ss:$48 sps:$4 sm:$0xff]   ;;  %v365_v20 = vunpack.c.l.bf16 %v876_v16  ;;  %s329_s23 = sshrl.u32 %s328_s21, 1  ;;  %vm357_vm5 = vcmp.lt.s32.totalorder %v356_v41, 392 }
  0x18   : > { %v868_v21 = vld [vmem:[%s1030_s20 + $0x20] sm:$0xf]  ;;  %632 = vrot.lane.b32.xlu0 %v631_v17, %s940_s22  ;;  %v307_v22 = vunpack.c.l.bf16 %v306_v19  ;;  %v483_v24 = vunpack.c.h.bf16 %v306_v19  ;;  %s330_s26 = sor.u32 %s329_s23, %s328_s21  ;;  %s304_s22 = scalar_lea.vmem %s1135_s8, %s860_s19 }
  0x19   : > { %v424_v23 = vunpack.c.l.bf16 %v868_v21  ;;  %v557_v26 = vsel %vm556_vm2, %v551_v18, %v996_v3  ;;  %v378_v27 = vsel %vm319_vm3, %v365_v20, %v996_v3  ;;  %s331_s30 = sand.u32 85, %s330_s26  ;;  %v643_v17 = vld [vmem:[%s1134_s7] sm:$0xf] }
  0x1a   : > { %v564_v29 = vsel %vm319_vm3, %v557_v26, %v996_v3  ;;  %v320_v30 = vsel %vm319_vm3, %v307_v22, %v996_v3  ;;  %v380_v32 = vpack.c.bf16 %v941_v31, %v378_v27  ;;  %s332_s9 = sshrl.u32 %s331_s30, 1  ;;  %v496_v37 = vsel %vm319_vm3, %v483_v24, %v996_v3 }
  0x1b   : > { %v437_v33 = vsel %vm319_vm3, %v424_v23, %v996_v3  ;;  %v566_v34 = vpack.c.bf16 %v941_v31, %v564_v29  ;;  %v321_v35 = vpack.c.bf16 %v941_v31, %v320_v30  ;;  %s333_s10 = sor.u32 %s332_s9, %s331_s30  ;;  %v498_v39 = vpack.c.bf16 %v941_v31, %v496_v37 }
  0x1c   : > { %v439_v36 = vpack.c.bf16 %v941_v31, %v437_v33  ;;  %382 = vst [vmem:[#allocation17 + $0x8] sm:$0xf] %v380_v32  ;;  %764 = vperm.xlu0 %921, %v761_v28   ;;  %s334_s3 = sand.u32 51, %s333_s10  ;;  %v644_v18 = vunpack.c.l.bf16 %v643_v17 }
  0x1d   : > { %568 = vst [vmem:[#allocation17 + $0x20] sm:$0xf] %v566_v34  ;;  %323 = vst [vmem:[#allocation17] sm:$0xf] %v321_v35  ;;  %s335_s5 = sshrl.u32 %s334_s3, 2 }
  0x1e   : > { %441 = vst [vmem:[#allocation17 + $0x10] sm:$0xf] %v439_v36  ;;  %500 = vst [vmem:[#allocation17 + $0x18] sm:$0xf] %v498_v39  ;;  %s336_s12 = sor.u32 %s335_s5, %s334_s3  ;;  %v650_v19 = vsel %vm649_vm7, %v644_v18, %v998_v4 }
  0x1f   : > { %s337_s14 = sand.u32 15, %s336_s12  ;;  %v662_v20 = vsel %vm657_vm8, %v650_v19, %v996_v3 }
  0x20   : > { %v870_v42 = vld [vmem:[%s1030_s20 + $0x24] sm:%s337_s14]  ;;  %v874_v43 = vld [vmem:[%s1030_s20 + $0x34] sm:%s337_s14] }
  0x21   : > { %v457_v45 = vunpack.c.l.bf16 %v870_v42  ;;  %v516_v46 = vunpack.c.l.bf16 %v874_v43  ;;  %v878_v47 = vld [vmem:[%s1030_s20 + $0x44] sm:%s337_s14]  ;;  %v866_v51 = vld [vmem:[%s1030_s20 + $0x14] sm:%s337_s14] }
  0x22   : > { %v862_v48 = vld [vmem:[%s1030_s20 + $0x4] sm:%s337_s14]  ;;  %v584_v49 = vunpack.c.l.bf16 %v878_v47  ;;  %v398_v54 = vunpack.c.l.bf16 %v866_v51 }
  0x23   : > { %v339_v50 = vunpack.c.l.bf16 %v862_v48  ;;  %v463_v52 = vsel %vm1067_vm4, %v996_v3, %v457_v45  ;;  %v522_v53 = vsel %vm1067_vm4, %v996_v3, %v516_v46 }
  0x24   : > { %v590_v55 = vsel %vm1067_vm4, %v996_v3, %v584_v49  ;;  %v476_v57 = vsel %vm357_vm5, %v463_v52, %v996_v3  ;;  %v535_v58 = vsel %vm357_vm5, %v522_v53, %v996_v3  ;;  %v404_v61 = vsel %vm1067_vm4, %v996_v3, %v398_v54  ;;  %v925_v11 = vld [vmem:[#allocation17] ss:$8 sps:$4 sm:$0xff]  }
  0x25   : > { %v345_v56 = vsel %vm1067_vm4, %v996_v3, %v339_v50  ;;  %v595_v59 = vsel %vm556_vm2, %v590_v55, %v996_v3  ;;  %v478_v62 = vpack.c.bf16 %v941_v31, %v476_v57  ;;  %v417_v1 = vsel %vm357_vm5, %v404_v61, %v996_v3  ;;  %v928_v13 = vld [vmem:[#allocation17 + $0x10] ss:$8 sps:$4 sm:$0xff]  }
  0x26   : > { %v358_v60 = vsel %vm357_vm5, %v345_v56, %v996_v3  ;;  %v603_v63 = vsel %vm357_vm5, %v595_v59, %v996_v3  ;;  %v537_v5 = vpack.c.bf16 %v941_v31, %v535_v58  ;;  %v419_v8 = vpack.c.bf16 %v941_v31, %v417_v1 }
  0x27   : > { %v360_v0 = vpack.c.bf16 %v941_v31, %v358_v60  ;;  %v605_v6 = vpack.c.bf16 %v941_v31, %v603_v63  ;;  %480 = vst [vmem:[#allocation17 + $0x14] sm:$0xf] %v478_v62 }
  0x28   : > { %539 = vst [vmem:[#allocation17 + $0x1c] sm:$0xf] %v537_v5  ;;  %421 = vst [vmem:[#allocation17 + $0xc] sm:$0xf] %v419_v8 }
  0x29   : > { %362 = vst [vmem:[#allocation17 + $0x4] sm:$0xf] %v360_v0  ;;  %607 = vst [vmem:[#allocation17 + $0x24] sm:$0xf] %v605_v6 }
  0x2f   : > { %v926_v9 = vld [vmem:[#allocation17 + $0x14] ss:$8 sps:$4 sm:$0xff]  }
  0x30   : > { %v923_v10 = vld [vmem:[#allocation17 + $0x4] ss:$8 sps:$4 sm:$0xff]  }
  0x31   : > { %v681_v12 = vld [vmem:[#allocation17 + $0x20] sm:$0xff]  ;;  %718 = vmatprep.subr.bf16.mxu0 %v923_v10 }
  0x32   : > { %719 = vmatpush1.bf16.msra.mxu0 %v925_v11  ;;  %v885_v14 = vcombine.high %v681_v12, %v681_v12  ;;  %v884_v15 = vcombine.low %v681_v12, %v681_v12 }
  0x33   : > { %720 = vmatprep.subr.bf16.mxu0 %v926_v9 }
  0x34   : > { %v713_v16 = vsel %vm711_vm6, %v884_v15, 0 }
  0x36   : > { %721 = vmatpush1.bf16.msra.mxu0 %v928_v13 }
  0x37   : > { %886 = vmatprep.subr.msk.bf16.mxu0 %vm711_vm6, %v885_v14 }
  0x3a   : > { %723 = vmatpush1.bf16.msra.mxu0 %v713_v16 }
  0x8a   : > { %v633_v21 = vpop.permute.xlu0 %632 }
  0x8b   : > { %v666_v22 = vsel %vm657_vm8, %v633_v21, %v996_v3 }
  0x8c   : > { %v670_v23 = vmax.f32 %v662_v20, %v666_v22 }
  0x8e   : > { %v672_v24 = vpack.c.bf16 %v941_v31, %v670_v23 }
  0x90   : > { %674 = vst [vmem:[#allocation18] sm:$0xf] %v672_v24 }
  0x91   : > { %v773_v7 = vpop.permute.xlu1 %772 }
  0x97   : > { %v676_v25 = vld [vmem:[#allocation18] sm:$0xf] }
  0x98   : > { %887 = vmatmul.mubr.msk.bf16.vlgmr.msra.gmra.mrb[0].mxu0 %vm707_vm9, %v676_v25 }
  0x9b   : > { %v765_v27 = vpop.permute.xlu0 %764 }
 0x16b   : > { %v752_v26 = vpop.f32.mrb[0].mxu0 }
 0x16c   : > { %v759_v28 = vmax.f32 %v752_v26, 0.0  ;;  %v754_v29 = vpop.f32.mrb[1].mxu0 }
 0x16d   : > { %v760_v30 = vmax.f32 %v754_v29, 0.0  ;;  %v756_v32 = vpop.f32.mrb[2].mxu0 }
 0x16e   : > { %v767_v33 = vmul.f32 %v765_v27, %v759_v28  ;;  %v757_v34 = vpop.f32.mrb[3].mxu0 }
 0x16f   : > { %v768_v35 = vmul.f32 %v765_v27, %v760_v30 }
 0x170   : > { %v775_v31 = vadd.f32 %v773_v7, %v767_v33 }
 0x171   : > { %v776_v36 = vadd.f32 %v773_v7, %v768_v35 }
 0x172   : > { %777 = vst [vmem:[%s304_s22] sm:$0xff] %v775_v31 }
 0x173   : > { %778 = vst [vmem:[%s304_s22 + $0x8] sm:$0xff] %v776_v36 }
 0x174 PF: > { %s39_s11 = sadd.s32 1, %s937_s11  }
 0x175   : > { %p36_p5 = scmp.ge.s32.totalorder %s39_s11, 4  }
 0x177   :  { %38 = sbr.rel (!%p36_p5) target bundleno = 3 (0x3), region = 91 }

</bundles_post_ra>
